<compile_context>
chip_gen: v7x
topology: tpu7x:2x2x1
jax: 0.10.0
libtpu: 0.0.40
codegen_flags: <defaults>
</compile_context>

<pallas_src>
import jax
import jax.numpy as jnp
import numpy as np
from jax.experimental import pallas as pl
from jax.experimental.pallas import tpu as pltpu

INPUT_DIM = 12
LATENT_DIM = 2
HIDDEN_DIMS = [75, 50, 25]
BATCH = 8

ENC_DIMS = [INPUT_DIM] + HIDDEN_DIMS + [2 * LATENT_DIM]       # 12 -> 75 -> 50 -> 25 -> 4
DEC_DIMS = [LATENT_DIM] + HIDDEN_DIMS[::-1] + [INPUT_DIM]     # 2 -> 25 -> 50 -> 75 -> 12
N_LAYERS = 8                                                  # PyTorch Linear layers
N_SLOTS = 9                                                   # enc last layer split into 2 heads
PAD = 128                                                     # lane-aligned feature width


def vae_kernel(xe_ref, w_ref, b_ref, out_ref):
    """Whole forward in one invocation; everything is full (8,128)-tiled.

    xe_ref : (2, B, 128)  [0] = zero-padded x, [1] = zero-padded eps
    w_ref  : (9, 128, 128) zero-padded weights, (in, out) layout.
             slots: enc0, enc1, enc2, mu-head, logstd-head, dec0, dec1, dec2, dec3
    b_ref  : (9, B, 128)  zero-padded, batch-pre-broadcast biases
    out_ref: (3, B, 128)  [0] = logits, [1] = mu, [2] = log_std (zero-padded)
    """

    def linear(h, idx, relu):
        y = jnp.dot(h, w_ref[idx], preferred_element_type=jnp.float32) + b_ref[idx]
        return jnp.maximum(y, 0.0) if relu else y

    # --- encoder MLP: 3 hidden ReLU layers ---
    h = xe_ref[0]
    h = linear(h, 0, True)
    h = linear(h, 1, True)
    h = linear(h, 2, True)

    # --- split head (done on host): mu / log_std directly, no lane slicing ---
    mu = linear(h, 3, False)
    log_std = linear(h, 4, False)

    # --- reparameterize: samples = mu + eps * exp(log_std) ---
    # Padded lanes: mu = 0 and eps = 0, so samples stay 0 there and the
    # zero-padded decoder weights keep the result exact.
    samples = mu + xe_ref[1] * jnp.exp(log_std)

    # --- decoder MLP: 3 hidden ReLU layers + final linear ---
    h = samples
    h = linear(h, 5, True)
    h = linear(h, 6, True)
    h = linear(h, 7, True)
    logits = linear(h, 8, False)

    # One lane-dense output slab, three unmasked full-tile stores.
    out_ref[0] = logits
    out_ref[1] = mu
    out_ref[2] = log_std


def init_params(key):
    """PyTorch-style Linear init: U(-1/sqrt(fan_in), +1/sqrt(fan_in)).
    Weights stored as (in, out) so y = x @ W + b."""
    dims = list(zip(ENC_DIMS[:-1], ENC_DIMS[1:])) + list(zip(DEC_DIMS[:-1], DEC_DIMS[1:]))
    weights, biases = [], []
    for fan_in, fan_out in dims:
        key, kw, kb = jax.random.split(key, 3)
        bound = 1.0 / np.sqrt(fan_in)
        weights.append(jax.random.uniform(kw, (fan_in, fan_out), jnp.float32, -bound, bound))
        biases.append(jax.random.uniform(kb, (fan_out,), jnp.float32, -bound, bound))
    return weights, biases


def pack_params(weights, biases, batch):
    """Host-side: split the mu/log_std head and zero-pad everything to
    lane-aligned (128,128) weight slabs and batch-pre-broadcast (B,128) biases."""
    w_list = [weights[0], weights[1], weights[2],
              weights[3][:, :LATENT_DIM], weights[3][:, LATENT_DIM:],
              weights[4], weights[5], weights[6], weights[7]]
    b_list = [biases[0], biases[1], biases[2],
              biases[3][:LATENT_DIM], biases[3][LATENT_DIM:],
              biases[4], biases[5], biases[6], biases[7]]

    w_packed = jnp.zeros((N_SLOTS, PAD, PAD), jnp.float32)
    b_packed = jnp.zeros((N_SLOTS, batch, PAD), jnp.float32)
    for i, (w, b) in enumerate(zip(w_list, b_list)):
        fi, fo = w.shape
        w_packed = w_packed.at[i, :fi, :fo].set(w)
        b_packed = b_packed.at[i, :, :fo].set(jnp.broadcast_to(b, (batch, fo)))
    return w_packed, b_packed


def approval_vae_forward(x, eps, w_packed, b_packed):
    B = x.shape[0]
    assert B % 8 == 0, "batch must be sublane-aligned (multiple of 8)"

    # Pack (and zero-pad) x and eps into one lane-dense input slab -> 1 DMA.
    xe = jnp.zeros((2, B, PAD), jnp.float32)
    xe = xe.at[0, :, :INPUT_DIM].set(x)
    xe = xe.at[1, :, :LATENT_DIM].set(eps)

    vmem = pl.BlockSpec(memory_space=pltpu.MemorySpace.VMEM)
    out = pl.pallas_call(
        vae_kernel,
        out_shape=jax.ShapeDtypeStruct((3, B, PAD), jnp.float32),
        in_specs=[vmem, vmem, vmem],
        out_specs=vmem,
    )(xe, w_packed, b_packed)

    logits = out[0, :, :INPUT_DIM]
    mu = out[1, :, :LATENT_DIM]
    log_std = out[2, :, :LATENT_DIM]
    return logits, mu, log_std


def reference_forward(x, eps, weights, biases):
    """Pure-JAX reference (unpadded) for a correctness check."""
    h = x
    for i in range(3):
        h = jnp.maximum(h @ weights[i] + biases[i], 0.0)
    enc = h @ weights[3] + biases[3]
    mu, log_std = enc[:, :LATENT_DIM], enc[:, LATENT_DIM:]
    h = mu + eps * jnp.exp(log_std)
    for i in range(4, 7):
        h = jnp.maximum(h @ weights[i] + biases[i], 0.0)
    logits = h @ weights[7] + biases[7]
    return logits, mu, log_std


if __name__ == "__main__":
    key = jax.random.PRNGKey(0)
    key, kx, keps, kparams = jax.random.split(key, 4)

    x = jax.random.normal(kx, (BATCH, INPUT_DIM), jnp.float32)
    # eps plays the role of torch.randn in reparamaterize(); generated outside
    # the kernel so the result is deterministic.
    eps = jax.random.normal(keps, (BATCH, LATENT_DIM), jnp.float32)

    weights, biases = init_params(kparams)
    w_packed, b_packed = pack_params(weights, biases, BATCH)

    logits, mu, log_std = approval_vae_forward(x, eps, w_packed, b_packed)
    jax.block_until_ready((logits, mu, log_std))

    ref_logits, ref_mu, ref_logstd = reference_forward(x, eps, weights, biases)
    np.testing.assert_allclose(np.asarray(logits), np.asarray(ref_logits), rtol=2e-3, atol=2e-3)
    np.testing.assert_allclose(np.asarray(mu), np.asarray(ref_mu), rtol=2e-3, atol=2e-3)
    np.testing.assert_allclose(np.asarray(log_std), np.asarray(ref_logstd), rtol=2e-3, atol=2e-3)

    print("KERNEL_OK")
</pallas_src>

<mosaic_0001>
module attributes {stable_mosaic.version = 11 : i64} {
  func.func @vae_kernel(%arg0: memref<2x8x128xf32, #tpu.memory_space<vmem>>, %arg1: memref<9x128x128xf32, #tpu.memory_space<vmem>>, %arg2: memref<9x8x128xf32, #tpu.memory_space<vmem>>, %arg3: memref<3x8x128xf32, #tpu.memory_space<vmem>>) attributes {dimension_semantics = [], scalar_prefetch = 0 : i64, scratch_operands = 0 : i64, tpu.core_type = #tpu.core_type<tc>} {
    %c0 = arith.constant 0 : index
    %c0_0 = arith.constant 0 : index
    %c0_1 = arith.constant 0 : index
    %0 = vector.load %arg0[%c0, %c0_0, %c0_1] : memref<2x8x128xf32, #tpu.memory_space<vmem>>, vector<1x8x128xf32>
    %1 = vector.shape_cast %0 : vector<1x8x128xf32> to vector<8x128xf32>
    %c0_2 = arith.constant 0 : index
    %c0_3 = arith.constant 0 : index
    %c0_4 = arith.constant 0 : index
    %2 = vector.load %arg1[%c0_2, %c0_3, %c0_4] : memref<9x128x128xf32, #tpu.memory_space<vmem>>, vector<1x128x128xf32>
    %3 = vector.shape_cast %2 : vector<1x128x128xf32> to vector<128x128xf32>
    %cst = arith.constant dense<0.000000e+00> : vector<8x128xf32>
    %4 = tpu.matmul %1, %3, %cst {dimension_numbers = #tpu.dot_dimension_numbers<[1], [0], [0], [1], [0, 0, 1, 1], [], []>} : vector<8x128xf32>, vector<128x128xf32>, vector<8x128xf32> -> vector<8x128xf32>
    %c0_5 = arith.constant 0 : index
    %c0_6 = arith.constant 0 : index
    %c0_7 = arith.constant 0 : index
    %5 = vector.load %arg2[%c0_5, %c0_6, %c0_7] : memref<9x8x128xf32, #tpu.memory_space<vmem>>, vector<1x8x128xf32>
    %6 = vector.shape_cast %5 : vector<1x8x128xf32> to vector<8x128xf32>
    %7 = arith.addf %4, %6 : vector<8x128xf32>
    %cst_8 = arith.constant 0.000000e+00 : f32
    %8 = vector.broadcast %cst_8 : f32 to vector<8x128xf32>
    %9 = arith.maximumf %7, %8 : vector<8x128xf32>
    %c1 = arith.constant 1 : index
    %c0_9 = arith.constant 0 : index
    %c0_10 = arith.constant 0 : index
    %10 = vector.load %arg1[%c1, %c0_9, %c0_10] : memref<9x128x128xf32, #tpu.memory_space<vmem>>, vector<1x128x128xf32>
    %11 = vector.shape_cast %10 : vector<1x128x128xf32> to vector<128x128xf32>
    %cst_11 = arith.constant dense<0.000000e+00> : vector<8x128xf32>
    %12 = tpu.matmul %9, %11, %cst_11 {dimension_numbers = #tpu.dot_dimension_numbers<[1], [0], [0], [1], [0, 0, 1, 1], [], []>} : vector<8x128xf32>, vector<128x128xf32>, vector<8x128xf32> -> vector<8x128xf32>
    %c1_12 = arith.constant 1 : index
    %c0_13 = arith.constant 0 : index
    %c0_14 = arith.constant 0 : index
    %13 = vector.load %arg2[%c1_12, %c0_13, %c0_14] : memref<9x8x128xf32, #tpu.memory_space<vmem>>, vector<1x8x128xf32>
    %14 = vector.shape_cast %13 : vector<1x8x128xf32> to vector<8x128xf32>
    %15 = arith.addf %12, %14 : vector<8x128xf32>
    %cst_15 = arith.constant 0.000000e+00 : f32
    %16 = vector.broadcast %cst_15 : f32 to vector<8x128xf32>
    %17 = arith.maximumf %15, %16 : vector<8x128xf32>
    %c2 = arith.constant 2 : index
    %c0_16 = arith.constant 0 : index
    %c0_17 = arith.constant 0 : index
    %18 = vector.load %arg1[%c2, %c0_16, %c0_17] : memref<9x128x128xf32, #tpu.memory_space<vmem>>, vector<1x128x128xf32>
    %19 = vector.shape_cast %18 : vector<1x128x128xf32> to vector<128x128xf32>
    %cst_18 = arith.constant dense<0.000000e+00> : vector<8x128xf32>
    %20 = tpu.matmul %17, %19, %cst_18 {dimension_numbers = #tpu.dot_dimension_numbers<[1], [0], [0], [1], [0, 0, 1, 1], [], []>} : vector<8x128xf32>, vector<128x128xf32>, vector<8x128xf32> -> vector<8x128xf32>
    %c2_19 = arith.constant 2 : index
    %c0_20 = arith.constant 0 : index
    %c0_21 = arith.constant 0 : index
    %21 = vector.load %arg2[%c2_19, %c0_20, %c0_21] : memref<9x8x128xf32, #tpu.memory_space<vmem>>, vector<1x8x128xf32>
    %22 = vector.shape_cast %21 : vector<1x8x128xf32> to vector<8x128xf32>
    %23 = arith.addf %20, %22 : vector<8x128xf32>
    %cst_22 = arith.constant 0.000000e+00 : f32
    %24 = vector.broadcast %cst_22 : f32 to vector<8x128xf32>
    %25 = arith.maximumf %23, %24 : vector<8x128xf32>
    %c3 = arith.constant 3 : index
    %c0_23 = arith.constant 0 : index
    %c0_24 = arith.constant 0 : index
    %26 = vector.load %arg1[%c3, %c0_23, %c0_24] : memref<9x128x128xf32, #tpu.memory_space<vmem>>, vector<1x128x128xf32>
    %27 = vector.shape_cast %26 : vector<1x128x128xf32> to vector<128x128xf32>
    %cst_25 = arith.constant dense<0.000000e+00> : vector<8x128xf32>
    %28 = tpu.matmul %25, %27, %cst_25 {dimension_numbers = #tpu.dot_dimension_numbers<[1], [0], [0], [1], [0, 0, 1, 1], [], []>} : vector<8x128xf32>, vector<128x128xf32>, vector<8x128xf32> -> vector<8x128xf32>
    %c3_26 = arith.constant 3 : index
    %c0_27 = arith.constant 0 : index
    %c0_28 = arith.constant 0 : index
    %29 = vector.load %arg2[%c3_26, %c0_27, %c0_28] : memref<9x8x128xf32, #tpu.memory_space<vmem>>, vector<1x8x128xf32>
    %30 = vector.shape_cast %29 : vector<1x8x128xf32> to vector<8x128xf32>
    %31 = arith.addf %28, %30 : vector<8x128xf32>
    %c4 = arith.constant 4 : index
    %c0_29 = arith.constant 0 : index
    %c0_30 = arith.constant 0 : index
    %32 = vector.load %arg1[%c4, %c0_29, %c0_30] : memref<9x128x128xf32, #tpu.memory_space<vmem>>, vector<1x128x128xf32>
    %33 = vector.shape_cast %32 : vector<1x128x128xf32> to vector<128x128xf32>
    %cst_31 = arith.constant dense<0.000000e+00> : vector<8x128xf32>
    %34 = tpu.matmul %25, %33, %cst_31 {dimension_numbers = #tpu.dot_dimension_numbers<[1], [0], [0], [1], [0, 0, 1, 1], [], []>} : vector<8x128xf32>, vector<128x128xf32>, vector<8x128xf32> -> vector<8x128xf32>
    %c4_32 = arith.constant 4 : index
    %c0_33 = arith.constant 0 : index
    %c0_34 = arith.constant 0 : index
    %35 = vector.load %arg2[%c4_32, %c0_33, %c0_34] : memref<9x8x128xf32, #tpu.memory_space<vmem>>, vector<1x8x128xf32>
    %36 = vector.shape_cast %35 : vector<1x8x128xf32> to vector<8x128xf32>
    %37 = arith.addf %34, %36 : vector<8x128xf32>
    %c1_35 = arith.constant 1 : index
    %c0_36 = arith.constant 0 : index
    %c0_37 = arith.constant 0 : index
    %38 = vector.load %arg0[%c1_35, %c0_36, %c0_37] : memref<2x8x128xf32, #tpu.memory_space<vmem>>, vector<1x8x128xf32>
    %39 = vector.shape_cast %38 : vector<1x8x128xf32> to vector<8x128xf32>
    %40 = math.exp %37 : vector<8x128xf32>
    %41 = arith.mulf %39, %40 : vector<8x128xf32>
    %42 = arith.addf %31, %41 : vector<8x128xf32>
    %c5 = arith.constant 5 : index
    %c0_38 = arith.constant 0 : index
    %c0_39 = arith.constant 0 : index
    %43 = vector.load %arg1[%c5, %c0_38, %c0_39] : memref<9x128x128xf32, #tpu.memory_space<vmem>>, vector<1x128x128xf32>
    %44 = vector.shape_cast %43 : vector<1x128x128xf32> to vector<128x128xf32>
    %cst_40 = arith.constant dense<0.000000e+00> : vector<8x128xf32>
    %45 = tpu.matmul %42, %44, %cst_40 {dimension_numbers = #tpu.dot_dimension_numbers<[1], [0], [0], [1], [0, 0, 1, 1], [], []>} : vector<8x128xf32>, vector<128x128xf32>, vector<8x128xf32> -> vector<8x128xf32>
    %c5_41 = arith.constant 5 : index
    %c0_42 = arith.constant 0 : index
    %c0_43 = arith.constant 0 : index
    %46 = vector.load %arg2[%c5_41, %c0_42, %c0_43] : memref<9x8x128xf32, #tpu.memory_space<vmem>>, vector<1x8x128xf32>
    %47 = vector.shape_cast %46 : vector<1x8x128xf32> to vector<8x128xf32>
    %48 = arith.addf %45, %47 : vector<8x128xf32>
    %cst_44 = arith.constant 0.000000e+00 : f32
    %49 = vector.broadcast %cst_44 : f32 to vector<8x128xf32>
    %50 = arith.maximumf %48, %49 : vector<8x128xf32>
    %c6 = arith.constant 6 : index
    %c0_45 = arith.constant 0 : index
    %c0_46 = arith.constant 0 : index
    %51 = vector.load %arg1[%c6, %c0_45, %c0_46] : memref<9x128x128xf32, #tpu.memory_space<vmem>>, vector<1x128x128xf32>
    %52 = vector.shape_cast %51 : vector<1x128x128xf32> to vector<128x128xf32>
    %cst_47 = arith.constant dense<0.000000e+00> : vector<8x128xf32>
    %53 = tpu.matmul %50, %52, %cst_47 {dimension_numbers = #tpu.dot_dimension_numbers<[1], [0], [0], [1], [0, 0, 1, 1], [], []>} : vector<8x128xf32>, vector<128x128xf32>, vector<8x128xf32> -> vector<8x128xf32>
    %c6_48 = arith.constant 6 : index
    %c0_49 = arith.constant 0 : index
    %c0_50 = arith.constant 0 : index
    %54 = vector.load %arg2[%c6_48, %c0_49, %c0_50] : memref<9x8x128xf32, #tpu.memory_space<vmem>>, vector<1x8x128xf32>
    %55 = vector.shape_cast %54 : vector<1x8x128xf32> to vector<8x128xf32>
    %56 = arith.addf %53, %55 : vector<8x128xf32>
    %cst_51 = arith.constant 0.000000e+00 : f32
    %57 = vector.broadcast %cst_51 : f32 to vector<8x128xf32>
    %58 = arith.maximumf %56, %57 : vector<8x128xf32>
    %c7 = arith.constant 7 : index
    %c0_52 = arith.constant 0 : index
    %c0_53 = arith.constant 0 : index
    %59 = vector.load %arg1[%c7, %c0_52, %c0_53] : memref<9x128x128xf32, #tpu.memory_space<vmem>>, vector<1x128x128xf32>
    %60 = vector.shape_cast %59 : vector<1x128x128xf32> to vector<128x128xf32>
    %cst_54 = arith.constant dense<0.000000e+00> : vector<8x128xf32>
    %61 = tpu.matmul %58, %60, %cst_54 {dimension_numbers = #tpu.dot_dimension_numbers<[1], [0], [0], [1], [0, 0, 1, 1], [], []>} : vector<8x128xf32>, vector<128x128xf32>, vector<8x128xf32> -> vector<8x128xf32>
    %c7_55 = arith.constant 7 : index
    %c0_56 = arith.constant 0 : index
    %c0_57 = arith.constant 0 : index
    %62 = vector.load %arg2[%c7_55, %c0_56, %c0_57] : memref<9x8x128xf32, #tpu.memory_space<vmem>>, vector<1x8x128xf32>
    %63 = vector.shape_cast %62 : vector<1x8x128xf32> to vector<8x128xf32>
    %64 = arith.addf %61, %63 : vector<8x128xf32>
    %cst_58 = arith.constant 0.000000e+00 : f32
    %65 = vector.broadcast %cst_58 : f32 to vector<8x128xf32>
    %66 = arith.maximumf %64, %65 : vector<8x128xf32>
    %c8 = arith.constant 8 : index
    %c0_59 = arith.constant 0 : index
    %c0_60 = arith.constant 0 : index
    %67 = vector.load %arg1[%c8, %c0_59, %c0_60] : memref<9x128x128xf32, #tpu.memory_space<vmem>>, vector<1x128x128xf32>
    %68 = vector.shape_cast %67 : vector<1x128x128xf32> to vector<128x128xf32>
    %cst_61 = arith.constant dense<0.000000e+00> : vector<8x128xf32>
    %69 = tpu.matmul %66, %68, %cst_61 {dimension_numbers = #tpu.dot_dimension_numbers<[1], [0], [0], [1], [0, 0, 1, 1], [], []>} : vector<8x128xf32>, vector<128x128xf32>, vector<8x128xf32> -> vector<8x128xf32>
    %c8_62 = arith.constant 8 : index
    %c0_63 = arith.constant 0 : index
    %c0_64 = arith.constant 0 : index
    %70 = vector.load %arg2[%c8_62, %c0_63, %c0_64] : memref<9x8x128xf32, #tpu.memory_space<vmem>>, vector<1x8x128xf32>
    %71 = vector.shape_cast %70 : vector<1x8x128xf32> to vector<8x128xf32>
    %72 = arith.addf %69, %71 : vector<8x128xf32>
    %c0_65 = arith.constant 0 : index
    %c0_66 = arith.constant 0 : index
    %c0_67 = arith.constant 0 : index
    %73 = vector.load %arg3[%c0_65, %c0_66, %c0_67] : memref<3x8x128xf32, #tpu.memory_space<vmem>>, vector<1x8x128xf32>
    %74 = vector.shape_cast %73 : vector<1x8x128xf32> to vector<8x128xf32>
    %75 = vector.shape_cast %72 : vector<8x128xf32> to vector<1x8x128xf32>
    tpu.vector_store %arg3[%c0_65, %c0_66, %c0_67], %75 {strides = array<i32>} : memref<3x8x128xf32, #tpu.memory_space<vmem>>, vector<1x8x128xf32>,
    %c1_68 = arith.constant 1 : index
    %c0_69 = arith.constant 0 : index
    %c0_70 = arith.constant 0 : index
    %76 = vector.load %arg3[%c1_68, %c0_69, %c0_70] : memref<3x8x128xf32, #tpu.memory_space<vmem>>, vector<1x8x128xf32>
    %77 = vector.shape_cast %76 : vector<1x8x128xf32> to vector<8x128xf32>
    %78 = vector.shape_cast %31 : vector<8x128xf32> to vector<1x8x128xf32>
    tpu.vector_store %arg3[%c1_68, %c0_69, %c0_70], %78 {strides = array<i32>} : memref<3x8x128xf32, #tpu.memory_space<vmem>>, vector<1x8x128xf32>,
    %c2_71 = arith.constant 2 : index
    %c0_72 = arith.constant 0 : index
    %c0_73 = arith.constant 0 : index
    %79 = vector.load %arg3[%c2_71, %c0_72, %c0_73] : memref<3x8x128xf32, #tpu.memory_space<vmem>>, vector<1x8x128xf32>
    %80 = vector.shape_cast %79 : vector<1x8x128xf32> to vector<8x128xf32>
    %81 = vector.shape_cast %37 : vector<8x128xf32> to vector<1x8x128xf32>
    tpu.vector_store %arg3[%c2_71, %c0_72, %c0_73], %81 {strides = array<i32>} : memref<3x8x128xf32, #tpu.memory_space<vmem>>, vector<1x8x128xf32>,
    return
  }
}

</mosaic_0001>

<bundles_post_ra>
// kernel: tpu_custom_call.1
= control target key start
LH: loop header
LB: loop body
LE: loop exit
PB: predicated region body
PF: predicated region fallthrough
CT: control target
= control target key end

     0   :  { %8 = vsyncpa [#allocation3], 0  ;;  %s1866_s0 = inlined_call_operand.hbm [shape: f32[2,8,128], index: 0, kind: input, shape index: {}]   ;;  %s1867_s1 = inlined_call_operand.hbm [shape: f32[9,128,128], index: 1, kind: input, shape index: {}]   ;;  %s1868_s2 = inlined_call_operand.hbm [shape: f32[9,8,128], index: 2, kind: input, shape index: {}]   ;;  %s1869_s3 = inlined_call_operand.hbm [shape: f32[3,8,128], index: 3, kind: output, shape index: {}]  }
   0x1   :  { %9 = vsyncpa [#allocation6], 0 }
   0x2   :  { %10 = vsyncpa [#allocation4], 0  ;;  %s1680_s12 = smov [#allocation5]   ;;  %s1681_s14 = smov [#allocation2]  }
   0x3   :  { %s28_s13 = sshll.u32 %s1680_s12, 4  ;;  %s16_s15 = sshll.u32 %s1681_s14, 4  ;;  %s29_s13 = int_to_ptr.vmem [resolvable:$true] %s28_s13  ;;  %s1709_s15 = int_to_ptr.vmem [resolvable:$true] %s16_s15 }
   0x4   :  { %s1586_s18 = scalar_lea.hbm %s1867_s1, 18432 }
   0x5   :  { %p1587_p0 = scmp.ne.s32.totalorder %s1867_s1, %s1586_s18  ;;  %p1590_p1 = scmp.lt.u32.totalorder %s1586_s18, %s1867_s1 }
   0x7   :  { %p1592_p2 = pnand %p1590_p1, %p1587_p0 }
   0x9   :  { %1595 = shalt.err (!%p1592_p2)
}
   0xa   :  { %s1596_s23 = scalar_lea.vmem %s29_s13, 18432  ;;  %p1601_p4 = scmp.lt.s32.totalorder %s29_s13, %s29_s13 }
   0xb   :  { %p1597_p3 = scmp.ne.s32.totalorder %s29_s13, %s1596_s23  ;;  %p1602_p5 = scmp.lt.s32.totalorder %s1596_s23, %s1596_s23 }
   0xd   :  { %p1603_p6 = por %p1602_p5, %p1601_p4 }
   0xf   :  { %p1604_p7 = pnand %p1603_p6, %p1597_p3 }
  0x11   :  { %1607 = shalt.err (!%p1604_p7)
}
  0x12   :  { %s1682_s24 = smov 128   ;;  %s1683_s25 = smov 8  }
  0x13   :  { %34 = dma.hbm_to_vmem [thread:$0]  %s1867_s1, 18432, %s29_s13, [#allocation6], %s1682_s24, %s1682_s24, %s1683_s25  }
  0x14   :  { %s1608_s30 = scalar_lea.hbm %s1866_s0, 256 }
  0x15   :  { %p1609_p8 = scmp.ne.s32.totalorder %s1866_s0, %s1608_s30  ;;  %p1612_p9 = scmp.lt.u32.totalorder %s1608_s30, %s1866_s0 }
  0x17   :  { %p1614_p10 = pnand %p1612_p9, %p1609_p8 }
  0x19   :  { %1617 = shalt.err (!%p1614_p10)
}
  0x1a   :  { %s1618_s8 = scalar_lea.vmem %s1709_s15, 256  ;;  %p1623_p12 = scmp.lt.s32.totalorder %s1709_s15, %s1709_s15 }
  0x1b   :  { %p1619_p11 = scmp.ne.s32.totalorder %s1709_s15, %s1618_s8  ;;  %p1624_p13 = scmp.lt.s32.totalorder %s1618_s8, %s1618_s8 }
  0x1d   :  { %p1625_p0 = por %p1624_p13, %p1623_p12 }
  0x1f   :  { %p1626_p1 = pnand %p1625_p0, %p1619_p11 }
  0x21   :  { %1629 = shalt.err (!%p1626_p1)
}
  0x22   :  { %22 = dma.hbm_to_vmem [thread:$0]  %s1866_s0, 256, %s1709_s15, [#allocation3], %s1682_s24, %s1682_s24, %s1683_s25  }
  0x23   :  { %s1684_s10 = smov [#allocation7]   ;;  %s1630_s14 = scalar_lea.hbm %s1868_s2, 1152 }
  0x24   :  { %s40_s11 = sshll.u32 %s1684_s10, 4  ;;  %p1631_p2 = scmp.ne.s32.totalorder %s1868_s2, %s1630_s14  ;;  %s41_s11 = int_to_ptr.vmem [resolvable:$true] %s40_s11 }
  0x25   :  { %p1634_p3 = scmp.lt.u32.totalorder %s1630_s14, %s1868_s2 }
  0x27   :  { %p1636_p4 = pnand %p1634_p3, %p1631_p2 }
  0x29   :  { %1639 = shalt.err (!%p1636_p4)
}
  0x2a   :  { %s1640_s20 = scalar_lea.vmem %s41_s11, 1152  ;;  %p1645_p6 = scmp.lt.s32.totalorder %s41_s11, %s41_s11 }
  0x2b   :  { %p1641_p5 = scmp.ne.s32.totalorder %s41_s11, %s1640_s20  ;;  %p1646_p7 = scmp.lt.s32.totalorder %s1640_s20, %s1640_s20 }
  0x2d   :  { %p1647_p8 = por %p1646_p7, %p1645_p6 }
  0x2f   :  { %p1648_p9 = pnand %p1647_p8, %p1641_p5 }
  0x31   :  { %1651 = shalt.err (!%p1648_p9)
}
  0x32   :  { %46 = dma.hbm_to_vmem [thread:$0]  %s1868_s2, 1152, %s41_s11, [#allocation6], %s1682_s24, %s1682_s24, %s1683_s25  }
  0x33   :  { %1674 = dma.done.wait [#allocation3], 256  }
  0x34   :  { %1675 = vsyncadd [#allocation3], 4294967040 }
  0x35   :  { %1676 = dma.done.wait [#allocation6], 19584  }
  0x36   :  { %1677 = vsyncadd [#allocation6], 4294947712  ;;  %v1685_v0 = vmov 0.0|0.0   ;;  %vm1686_vm0 = vmmov 0   ;;  %v1687_v1 = vmov 0.0   ;;  %v57_v2 = vld [vmem:[#allocation5] sm:$0xff] }
  0x37   :  { %1359 = vmatprep.subr.bf16.mxu0 %v1685_v0  ;;  %1076 = vmatprep.mubr.msk.f32.mxu0 %vm1686_vm0, %v1687_v1  ;;  %v58_v3 = vld [vmem:[#allocation5 + $0x8] sm:$0xff]  ;;  %v59_v4 = vld [vmem:[#allocation5 + $0x10] sm:$0xff]  ;;  %v60_v6 = vld [vmem:[#allocation5 + $0x18] sm:$0xff]  ;;  %s1688_s2 = smov [#allocation8]  }
  0x38   :  { %1383 = vmatprep.subr.bf16.mxu1 %v1685_v0  ;;  %1111 = vmatprep.mubr.msk.f32.mxu1 %vm1686_vm0, %v1687_v1  ;;  %v1360_v5 = vpack.c.bf16 %v58_v3, %v57_v2  ;;  %v1363_v7 = vpack.c.bf16 %v60_v6, %v59_v4  ;;  %v61_v8 = vld [vmem:[#allocation5 + $0x20] sm:$0xff]  ;;  %v62_v9 = vld [vmem:[#allocation5 + $0x28] sm:$0xff]  ;;  %v148_v12 = vld [vmem:[#allocation5 + $0x90] sm:$0xff]  ;;  %s878_s21 = sshll.u32 %s1688_s2, 4  ;;  %s879_s21 = int_to_ptr.vmem [resolvable:$true] %s878_s21 }
  0x39   :  { %v146_v10 = vld [vmem:[#allocation5 + $0x80] sm:$0xff]  ;;  %v147_v11 = vld [vmem:[#allocation5 + $0x88] sm:$0xff]  ;;  %v149_v13 = vld [vmem:[#allocation5 + $0x98] sm:$0xff]  ;;  %v1366_v14 = vpack.c.bf16 %v62_v9, %v61_v8  ;;  %s1652_s22 = scalar_lea.vmem %s879_s21, 384  ;;  %p1657_p11 = scmp.lt.s32.totalorder %s879_s21, %s879_s21 }
  0x3a   :  { %1361 = vmatpush3.bf16.msra.mxu0 %v1360_v5  ;;  %v1384_v15 = vpack.c.bf16 %v147_v11, %v146_v10  ;;  %v63_v16 = vld [vmem:[#allocation5 + $0x30] sm:$0xff]  ;;  %v64_v17 = vld [vmem:[#allocation5 + $0x38] sm:$0xff]  ;;  %v1387_v18 = vpack.c.bf16 %v149_v13, %v148_v12  ;;  %v150_v19 = vld [vmem:[#allocation5 + $0xa0] sm:$0xff]  ;;  %p1653_p10 = scmp.ne.s32.totalorder %s879_s21, %s1652_s22  ;;  %p1658_p12 = scmp.lt.s32.totalorder %s1652_s22, %s1652_s22 }
  0x3b   :  { %1362 = vmatprep.subr.bf16.mxu0 %v1685_v0  ;;  %v151_v20 = vld [vmem:[#allocation5 + $0xa8] sm:$0xff]  ;;  %v1369_v21 = vpack.c.bf16 %v64_v17, %v63_v16  ;;  %v65_v22 = vld [vmem:[#allocation5 + $0x40] sm:$0xff]  ;;  %v152_v25 = vld [vmem:[#allocation5 + $0xb0] sm:$0xff] }
  0x3c   :  { %1385 = vmatpush3.bf16.msra.mxu1 %v1384_v15  ;;  %v66_v23 = vld [vmem:[#allocation5 + $0x48] sm:$0xff]  ;;  %v1390_v24 = vpack.c.bf16 %v151_v20, %v150_v19  ;;  %v153_v26 = vld [vmem:[#allocation5 + $0xb8] sm:$0xff]  ;;  %v67_v28 = vld [vmem:[#allocation5 + $0x50] sm:$0xff]  ;;  %p1659_p13 = por %p1658_p12, %p1657_p11 }
  0x3d   :  { %1386 = vmatprep.subr.bf16.mxu1 %v1685_v0  ;;  %v1372_v27 = vpack.c.bf16 %v66_v23, %v65_v22  ;;  %v68_v29 = vld [vmem:[#allocation5 + $0x58] sm:$0xff]  ;;  %v1393_v30 = vpack.c.bf16 %v153_v26, %v152_v25  ;;  %v154_v31 = vld [vmem:[#allocation5 + $0xc0] sm:$0xff]  ;;  %v155_v32 = vld [vmem:[#allocation5 + $0xc8] sm:$0xff] }
  0x3e   :  { %1364 = vmatpush3.bf16.msra.mxu0 %v1363_v7  ;;  %v1375_v33 = vpack.c.bf16 %v68_v29, %v67_v28  ;;  %v69_v34 = vld [vmem:[#allocation5 + $0x60] sm:$0xff]  ;;  %v70_v35 = vld [vmem:[#allocation5 + $0x68] sm:$0xff]  ;;  %v1396_v36 = vpack.c.bf16 %v155_v32, %v154_v31  ;;  %v156_v37 = vld [vmem:[#allocation5 + $0xd0] sm:$0xff]  ;;  %p1660_p0 = pnand %p1659_p13, %p1653_p10 }
  0x3f   :  { %1365 = vmatprep.subr.bf16.mxu0 %v1685_v0  ;;  %v157_v38 = vld [vmem:[#allocation5 + $0xd8] sm:$0xff]  ;;  %v1378_v39 = vpack.c.bf16 %v70_v35, %v69_v34  ;;  %v71_v40 = vld [vmem:[#allocation5 + $0x70] sm:$0xff]  ;;  %v158_v43 = vld [vmem:[#allocation5 + $0xe0] sm:$0xff] }
  0x40   :  { %1388 = vmatpush3.bf16.msra.mxu1 %v1387_v18  ;;  %v72_v41 = vld [vmem:[#allocation5 + $0x78] sm:$0xff]  ;;  %v1399_v42 = vpack.c.bf16 %v157_v38, %v156_v37  ;;  %v159_v44 = vld [vmem:[#allocation5 + $0xe8] sm:$0xff]  ;;  %v56_v47 = vld [vmem:[#allocation2] sm:$0xff] }
  0x41   :  { %1389 = vmatprep.subr.bf16.mxu1 %v1685_v0  ;;  %v1381_v45 = vpack.c.bf16 %v72_v41, %v71_v40  ;;  %v1402_v46 = vpack.c.bf16 %v159_v44, %v158_v43  ;;  %v160_v48 = vld [vmem:[#allocation5 + $0xf0] sm:$0xff]  ;;  %v161_v49 = vld [vmem:[#allocation5 + $0xf8] sm:$0xff]  ;;  %v236_v51 = vld [vmem:[#allocation5 + $0x100] sm:$0xff] }
  0x42   :  { %1367 = vmatpush3.bf16.msra.mxu0 %v1366_v14  ;;  %v1405_v50 = vpack.c.bf16 %v161_v49, %v160_v48  ;;  %v237_v52 = vld [vmem:[#allocation5 + $0x108] sm:$0xff]  ;;  %v238_v53 = vld [vmem:[#allocation5 + $0x110] sm:$0xff]  ;;  %v239_v55 = vld [vmem:[#allocation5 + $0x118] sm:$0xff] }
  0x43   :  { %1368 = vmatprep.subr.bf16.mxu0 %v1685_v0  ;;  %v1408_v54 = vpack.c.bf16 %v237_v52, %v236_v51  ;;  %v1411_v56 = vpack.c.bf16 %v239_v55, %v238_v53  ;;  %v240_v57 = vld [vmem:[#allocation5 + $0x120] sm:$0xff]  ;;  %v241_v58 = vld [vmem:[#allocation5 + $0x128] sm:$0xff]  ;;  %v242_v60 = vld [vmem:[#allocation5 + $0x130] sm:$0xff] }
  0x44   :  { %1391 = vmatpush3.bf16.msra.mxu1 %v1390_v24  ;;  %v1414_v59 = vpack.c.bf16 %v241_v58, %v240_v57  ;;  %v243_v61 = vld [vmem:[#allocation5 + $0x138] sm:$0xff]  ;;  %v244_v63 = vld [vmem:[#allocation5 + $0x140] sm:$0xff]  ;;  %v245_v2 = vld [vmem:[#allocation5 + $0x148] sm:$0xff] }
  0x45   :  { %1392 = vmatprep.subr.bf16.mxu1 %v1685_v0  ;;  %v1417_v62 = vpack.c.bf16 %v243_v61, %v242_v60  ;;  %v1420_v3 = vpack.c.bf16 %v245_v2, %v244_v63  ;;  %v246_v4 = vld [vmem:[#allocation5 + $0x150] sm:$0xff]  ;;  %v247_v5 = vld [vmem:[#allocation5 + $0x158] sm:$0xff]  ;;  %v248_v7 = vld [vmem:[#allocation5 + $0x160] sm:$0xff] }
  0x46   :  { %1370 = vmatpush3.bf16.msra.mxu0 %v1369_v21  ;;  %v1423_v6 = vpack.c.bf16 %v247_v5, %v246_v4  ;;  %v249_v8 = vld [vmem:[#allocation5 + $0x168] sm:$0xff]  ;;  %v73_v10 = vld [vmem:[#allocation7] sm:$0xff]  ;;  %v250_v15 = vld [vmem:[#allocation5 + $0x170] sm:$0xff] }
  0x47   :  { %1371 = vmatprep.subr.bf16.mxu0 %v1685_v0  ;;  %v1426_v9 = vpack.c.bf16 %v249_v8, %v248_v7  ;;  %v251_v16 = vld [vmem:[#allocation5 + $0x178] sm:$0xff]  ;;  %v326_v18 = vld [vmem:[#allocation5 + $0x180] sm:$0xff]  ;;  %v327_v19 = vld [vmem:[#allocation5 + $0x188] sm:$0xff] }
  0x48   :  { %1394 = vmatpush3.bf16.msra.mxu1 %v1393_v30  ;;  %v1429_v17 = vpack.c.bf16 %v251_v16, %v250_v15  ;;  %v1432_v20 = vpack.c.bf16 %v327_v19, %v326_v18  ;;  %v328_v21 = vld [vmem:[#allocation5 + $0x190] sm:$0xff]  ;;  %v329_v22 = vld [vmem:[#allocation5 + $0x198] sm:$0xff]  ;;  %v330_v24 = vld [vmem:[#allocation5 + $0x1a0] sm:$0xff] }
  0x49   :  { %1395 = vmatprep.subr.bf16.mxu1 %v1685_v0  ;;  %v1435_v23 = vpack.c.bf16 %v329_v22, %v328_v21  ;;  %v331_v25 = vld [vmem:[#allocation5 + $0x1a8] sm:$0xff]  ;;  %v333_v28 = vld [vmem:[#allocation5 + $0x1b8] sm:$0xff]  ;;  %v334_v30 = vld [vmem:[#allocation5 + $0x1c0] sm:$0xff] }
  0x4a   :  { %1373 = vmatpush3.bf16.msra.mxu0 %v1372_v27  ;;  %v1438_v26 = vpack.c.bf16 %v331_v25, %v330_v24  ;;  %v332_v27 = vld [vmem:[#allocation5 + $0x1b0] sm:$0xff]  ;;  %v335_v31 = vld [vmem:[#allocation5 + $0x1c8] sm:$0xff]  ;;  %v337_v34 = vld [vmem:[#allocation5 + $0x1d8] sm:$0xff] }
  0x4b   :  { %1374 = vmatprep.subr.bf16.mxu0 %v1685_v0  ;;  %v1441_v29 = vpack.c.bf16 %v333_v28, %v332_v27  ;;  %v1444_v32 = vpack.c.bf16 %v335_v31, %v334_v30  ;;  %v339_v37 = vld [vmem:[#allocation5 + $0x1e8] sm:$0xff]  ;;  %v415_v40 = vld [vmem:[#allocation5 + $0x200] sm:$0xff]  ;;  %v418_v48 = vld [vmem:[#allocation5 + $0x218] sm:$0xff] }
  0x4c   :  { %1397 = vmatpush3.bf16.msra.mxu1 %v1396_v36  ;;  %v338_v36 = vld [vmem:[#allocation5 + $0x1e0] sm:$0xff]  ;;  %v416_v41 = vld [vmem:[#allocation5 + $0x208] sm:$0xff]  ;;  %v421_v53 = vld [vmem:[#allocation5 + $0x230] sm:$0xff] }
  0x4d   :  { %1398 = vmatprep.subr.bf16.mxu1 %v1685_v0  ;;  %v1450_v38 = vpack.c.bf16 %v339_v37, %v338_v36  ;;  %v420_v51 = vld [vmem:[#allocation5 + $0x228] sm:$0xff]  ;;  %v426_v60 = vld [vmem:[#allocation5 + $0x258] sm:$0xff]  ;;  %v429_v5 = vld [vmem:[#allocation5 + $0x270] sm:$0xff] }
  0x4e   :  { %1376 = vmatpush3.bf16.msra.mxu0 %v1375_v33  ;;  %v336_v33 = vld [vmem:[#allocation5 + $0x1d0] sm:$0xff]  ;;  %v424_v57 = vld [vmem:[#allocation5 + $0x248] sm:$0xff]  ;;  %v341_v4 = vld [vmem:[#allocation5 + $0x1f8] sm:$0xff] }
  0x4f   :  { %1377 = vmatprep.subr.bf16.mxu0 %v1685_v0  ;;  %v1447_v35 = vpack.c.bf16 %v337_v34, %v336_v33  ;;  %v428_v63 = vld [vmem:[#allocation5 + $0x268] sm:$0xff]  ;;  %v430_v7 = vld [vmem:[#allocation5 + $0x278] sm:$0xff] }
  0x50   :  { %1400 = vmatpush3.bf16.msra.mxu1 %v1399_v42  ;;  %v1477_v8 = vpack.c.bf16 %v430_v7, %v429_v5  ;;  %v513_v18 = vld [vmem:[#allocation5 + $0x298] sm:$0xff]  ;;  %v515_v21 = vld [vmem:[#allocation5 + $0x2a8] sm:$0xff] }
  0x51   :  { %1401 = vmatprep.subr.bf16.mxu1 %v1685_v0  ;;  %v517_v24 = vld [vmem:[#allocation5 + $0x2b8] sm:$0xff]  ;;  %v519_v27 = vld [vmem:[#allocation5 + $0x2c8] sm:$0xff] }
  0x52   :  { %1379 = vmatpush3.bf16.msra.mxu0 %v1378_v39  ;;  %v163_v39 = vld [vmem:[#allocation7 + $0x8] sm:$0xff]  ;;  %v521_v30 = vld [vmem:[#allocation5 + $0x2d8] sm:$0xff] }
  0x53   :  { %1380 = vmatprep.subr.bf16.mxu0 %v1685_v0  ;;  %v523_v33 = vld [vmem:[#allocation5 + $0x2e8] sm:$0xff]  ;;  %v525_v36 = vld [vmem:[#allocation5 + $0x2f8] sm:$0xff] }
  0x54   :  { %1403 = vmatpush3.bf16.msra.mxu1 %v1402_v46 }
  0x55   :  { %1404 = vmatprep.subr.bf16.mxu1 %v1685_v0 }
  0x56   :  { %1382 = vmatpush3.bf16.msra.mxu0 %v1381_v45  ;;  %v1456_v45 = vpack.c.bf16 %v416_v41, %v415_v40  ;;  %v602_v40 = vld [vmem:[#allocation5 + $0x310] sm:$0xff] }
  0x57   :  { %1407 = vmatprep.subr.bf16.mxu0 %v1685_v0 }
  0x58   :  { %1406 = vmatpush3.bf16.msra.mxu1 %v1405_v50  ;;  %v419_v50 = vld [vmem:[#allocation5 + $0x220] sm:$0xff] }
  0x59   :  { %1077 = vmatmul.mubr.f32.vlgmr.msra.gmra.mrb[0].mxu0 %v56_v47  ;;  %1431 = vmatprep.subr.bf16.mxu1 %v1685_v0  ;;  %v417_v47 = vld [vmem:[#allocation5 + $0x210] sm:$0xff]  ;;  %v1462_v52 = vpack.c.bf16 %v420_v51, %v419_v50  ;;  %v608_v50 = vld [vmem:[#allocation5 + $0x340] sm:$0xff]  ;;  %v609_v51 = vld [vmem:[#allocation5 + $0x348] sm:$0xff] }
  0x5a   :  { %1146 = vmatprep.mubr.msk.f32.mxu0 %vm1686_vm0, %v1687_v1  ;;  %1409 = vmatpush3.bf16.msra.mxu0 %v1408_v54  ;;  %v1459_v49 = vpack.c.bf16 %v418_v48, %v417_v47  ;;  %v422_v54 = vld [vmem:[#allocation5 + $0x238] sm:$0xff]  ;;  %v606_v47 = vld [vmem:[#allocation5 + $0x330] sm:$0xff] }
  0x5b   :  { %1410 = vmatprep.subr.bf16.mxu0 %v1685_v0  ;;  %v1465_v55 = vpack.c.bf16 %v422_v54, %v421_v53  ;;  %v607_v48 = vld [vmem:[#allocation5 + $0x338] sm:$0xff]  ;;  %v610_v53 = vld [vmem:[#allocation5 + $0x350] sm:$0xff] }
  0x5c   :  { %v611_v54 = vld [vmem:[#allocation5 + $0x358] sm:$0xff] }
  0x5e   :  { %1412 = vmatpush3.bf16.msra.mxu0 %v1411_v56  ;;  %v423_v56 = vld [vmem:[#allocation5 + $0x240] sm:$0xff] }
  0x5f   :  { %1413 = vmatprep.subr.bf16.mxu0 %v1685_v0  ;;  %v1468_v58 = vpack.c.bf16 %v424_v57, %v423_v56  ;;  %v612_v56 = vld [vmem:[#allocation5 + $0x360] sm:$0xff]  ;;  %v613_v57 = vld [vmem:[#allocation5 + $0x368] sm:$0xff] }
  0x62   :  { %1415 = vmatpush3.bf16.msra.mxu0 %v1414_v59  ;;  %v425_v59 = vld [vmem:[#allocation5 + $0x250] sm:$0xff] }
  0x63   :  { %1416 = vmatprep.subr.bf16.mxu0 %v1685_v0  ;;  %v1471_v61 = vpack.c.bf16 %v426_v60, %v425_v59  ;;  %v343_v59 = vld [vmem:[#allocation7 + $0x18] sm:$0xff]  ;;  %v432_v60 = vld [vmem:[#allocation7 + $0x20] sm:$0xff] }
  0x66   :  { %1418 = vmatpush3.bf16.msra.mxu0 %v1417_v62  ;;  %v427_v62 = vld [vmem:[#allocation5 + $0x260] sm:$0xff] }
  0x67   :  { %1419 = vmatprep.subr.bf16.mxu0 %v1685_v0  ;;  %v1474_v2 = vpack.c.bf16 %v428_v63, %v427_v62 }
  0x6a   :  { %1421 = vmatpush3.bf16.msra.mxu0 %v1420_v3  ;;  %v340_v3 = vld [vmem:[#allocation5 + $0x1f0] sm:$0xff] }
  0x6b   :  { %1422 = vmatprep.subr.bf16.mxu0 %v1685_v0 }
  0x6e   :  { %1424 = vmatpush3.bf16.msra.mxu0 %v1423_v6  ;;  %v1453_v6 = vpack.c.bf16 %v341_v4, %v340_v3 }
  0x6f   :  { %1425 = vmatprep.subr.bf16.mxu0 %v1685_v0 }
  0x72   :  { %1427 = vmatpush3.bf16.msra.mxu0 %v1426_v9  ;;  %v253_v9 = vld [vmem:[#allocation7 + $0x10] sm:$0xff] }
  0x73   :  { %1428 = vmatprep.subr.bf16.mxu0 %v1685_v0 }
  0x76   :  { %1430 = vmatpush3.bf16.msra.mxu0 %v1429_v17  ;;  %v512_v17 = vld [vmem:[#allocation5 + $0x290] sm:$0xff] }
  0x77   :  { %1455 = vmatprep.subr.bf16.mxu0 %v1685_v0  ;;  %v1483_v19 = vpack.c.bf16 %v513_v18, %v512_v17  ;;  %v693_v17 = vld [vmem:[#allocation5 + $0x398] sm:$0xff] }
 0x12c   :  { %v140_v11 = vpop.f32.mrb[0].mxu0 }
 0x12d   :  { %v141_v12 = vadd.f32 %v140_v11, %v73_v10  ;;  %v1078_v13 = vpop.f32.mrb[1].mxu0  ;;  %v510_v10 = vld [vmem:[#allocation5 + $0x280] sm:$0xff]  ;;  %v511_v11 = vld [vmem:[#allocation5 + $0x288] sm:$0xff] }
 0x12e   :  { %v1480_v15 = vpack.c.bf16 %v511_v11, %v510_v10  ;;  %v614_v10 = vld [vmem:[#allocation5 + $0x370] sm:$0xff]  ;;  %v615_v11 = vld [vmem:[#allocation5 + $0x378] sm:$0xff] }
 0x12f   :  { %v144_v14 = vmax.f32 %v141_v12, 0.0 }
 0x131   :  { %1112 = vmatmul.mubr.f32.vlgmr.msra.gmra.mrb[0].mxu1 %v144_v14 }
 0x132   :  { %1181 = vmatprep.mubr.msk.f32.mxu1 %vm1686_vm0, %v1687_v1  ;;  %1433 = vmatpush3.bf16.msra.mxu1 %v1432_v20  ;;  %v514_v20 = vld [vmem:[#allocation5 + $0x2a0] sm:$0xff] }
 0x133   :  { %1434 = vmatprep.subr.bf16.mxu1 %v1685_v0  ;;  %v1486_v22 = vpack.c.bf16 %v515_v21, %v514_v20  ;;  %v695_v20 = vld [vmem:[#allocation5 + $0x3a8] sm:$0xff] }
 0x136   :  { %1436 = vmatpush3.bf16.msra.mxu1 %v1435_v23  ;;  %v516_v23 = vld [vmem:[#allocation5 + $0x2b0] sm:$0xff] }
 0x137   :  { %1437 = vmatprep.subr.bf16.mxu1 %v1685_v0  ;;  %v1489_v25 = vpack.c.bf16 %v517_v24, %v516_v23  ;;  %v697_v23 = vld [vmem:[#allocation5 + $0x3b8] sm:$0xff] }
 0x13a   :  { %1439 = vmatpush3.bf16.msra.mxu1 %v1438_v26  ;;  %v518_v26 = vld [vmem:[#allocation5 + $0x2c0] sm:$0xff] }
 0x13b   :  { %1440 = vmatprep.subr.bf16.mxu1 %v1685_v0  ;;  %v1492_v28 = vpack.c.bf16 %v519_v27, %v518_v26  ;;  %v699_v26 = vld [vmem:[#allocation5 + $0x3c8] sm:$0xff] }
 0x13e   :  { %1442 = vmatpush3.bf16.msra.mxu1 %v1441_v29  ;;  %v520_v29 = vld [vmem:[#allocation5 + $0x2d0] sm:$0xff] }
 0x13f   :  { %1443 = vmatprep.subr.bf16.mxu1 %v1685_v0  ;;  %v1495_v31 = vpack.c.bf16 %v521_v30, %v520_v29  ;;  %v701_v29 = vld [vmem:[#allocation5 + $0x3d8] sm:$0xff] }
 0x142   :  { %1445 = vmatpush3.bf16.msra.mxu1 %v1444_v32  ;;  %v522_v32 = vld [vmem:[#allocation5 + $0x2e0] sm:$0xff] }
 0x143   :  { %1446 = vmatprep.subr.bf16.mxu1 %v1685_v0  ;;  %v1498_v34 = vpack.c.bf16 %v523_v33, %v522_v32  ;;  %v703_v32 = vld [vmem:[#allocation5 + $0x3e8] sm:$0xff] }
 0x146   :  { %1448 = vmatpush3.bf16.msra.mxu1 %v1447_v35  ;;  %v524_v35 = vld [vmem:[#allocation5 + $0x2f0] sm:$0xff] }
 0x147   :  { %1449 = vmatprep.subr.bf16.mxu1 %v1685_v0  ;;  %v1501_v37 = vpack.c.bf16 %v525_v36, %v524_v35 }
 0x14a   :  { %1451 = vmatpush3.bf16.msra.mxu1 %v1450_v38  ;;  %v600_v38 = vld [vmem:[#allocation5 + $0x300] sm:$0xff] }
 0x14b   :  { %1452 = vmatprep.subr.bf16.mxu1 %v1685_v0 }
 0x14e   :  { %1454 = vmatpush3.bf16.msra.mxu1 %v1453_v6  ;;  %v504_v6 = vld [vmem:[#allocation2 + $0x8] sm:$0xff] }
 0x14f   :  { %1479 = vmatprep.subr.bf16.mxu1 %v1685_v0 }
 0x204   :  { %v230_v42 = vpop.f32.mrb[0].mxu1 }
 0x205   :  { %v231_v43 = vadd.f32 %v230_v42, %v163_v39  ;;  %v1113_v44 = vpop.f32.mrb[1].mxu1  ;;  %v601_v39 = vld [vmem:[#allocation5 + $0x308] sm:$0xff]  ;;  %v603_v42 = vld [vmem:[#allocation5 + $0x318] sm:$0xff] }
 0x206   :  { %v1504_v41 = vpack.c.bf16 %v601_v39, %v600_v38  ;;  %v604_v44 = vld [vmem:[#allocation5 + $0x320] sm:$0xff]  ;;  %v704_v39 = vld [vmem:[#allocation5 + $0x3f0] sm:$0xff] }
 0x207   :  { %v234_v46 = vmax.f32 %v231_v43, 0.0  ;;  %v1507_v43 = vpack.c.bf16 %v603_v42, %v602_v40  ;;  %v705_v40 = vld [vmem:[#allocation5 + $0x3f8] sm:$0xff]  ;;  %v780_v42 = vld [vmem:[#allocation5 + $0x400] sm:$0xff] }
 0x209   :  { %1147 = vmatmul.mubr.f32.vlgmr.msra.gmra.mrb[2].mxu0 %v234_v46 }
 0x20a   :  { %1457 = vmatpush3.bf16.msra.mxu0 %v1456_v45  ;;  %1216 = vmatprep.mubr.msk.f32.mxu0 %vm1686_vm0, %v1687_v1  ;;  %v605_v45 = vld [vmem:[#allocation5 + $0x328] sm:$0xff] }
 0x20b   :  { %1458 = vmatprep.subr.bf16.mxu0 %v1685_v0  ;;  %v1510_v46 = vpack.c.bf16 %v605_v45, %v604_v44  ;;  %v782_v44 = vld [vmem:[#allocation5 + $0x410] sm:$0xff] }
 0x20e   :  { %1460 = vmatpush3.bf16.msra.mxu0 %v1459_v49  ;;  %v1513_v49 = vpack.c.bf16 %v607_v48, %v606_v47  ;;  %v784_v48 = vld [vmem:[#allocation5 + $0x420] sm:$0xff] }
 0x20f   :  { %1461 = vmatprep.subr.bf16.mxu0 %v1685_v0 }
 0x212   :  { %1463 = vmatpush3.bf16.msra.mxu0 %v1462_v52  ;;  %v1516_v52 = vpack.c.bf16 %v609_v51, %v608_v50  ;;  %v787_v51 = vld [vmem:[#allocation5 + $0x438] sm:$0xff] }
 0x213   :  { %1464 = vmatprep.subr.bf16.mxu0 %v1685_v0 }
 0x216   :  { %1466 = vmatpush3.bf16.msra.mxu0 %v1465_v55  ;;  %v1519_v55 = vpack.c.bf16 %v611_v54, %v610_v53  ;;  %v788_v53 = vld [vmem:[#allocation5 + $0x440] sm:$0xff]  ;;  %v789_v54 = vld [vmem:[#allocation5 + $0x448] sm:$0xff] }
 0x217   :  { %1467 = vmatprep.subr.bf16.mxu0 %v1685_v0 }
 0x21a   :  { %1469 = vmatpush3.bf16.msra.mxu0 %v1468_v58  ;;  %v1522_v58 = vpack.c.bf16 %v613_v57, %v612_v56  ;;  %v790_v56 = vld [vmem:[#allocation5 + $0x450] sm:$0xff]  ;;  %v791_v57 = vld [vmem:[#allocation5 + $0x458] sm:$0xff] }
 0x21b   :  { %1470 = vmatprep.subr.bf16.mxu0 %v1685_v0 }
 0x21e   :  { %1472 = vmatpush3.bf16.msra.mxu0 %v1471_v61 }
 0x21f   :  { %1473 = vmatprep.subr.bf16.mxu0 %v1685_v0 }
 0x222   :  { %1475 = vmatpush3.bf16.msra.mxu0 %v1474_v2 }
 0x223   :  { %1476 = vmatprep.subr.bf16.mxu0 %v1685_v0 }
 0x226   :  { %1478 = vmatpush3.bf16.msra.mxu0 %v1477_v8 }
 0x227   :  { %1503 = vmatprep.subr.bf16.mxu0 %v1685_v0 }
 0x2dc   :  { %v320_v12 = vpop.f32.mrb[2].mxu0 }
 0x2dd   :  { %v321_v13 = vadd.f32 %v320_v12, %v253_v9  ;;  %v1148_v14 = vpop.f32.mrb[3].mxu0  ;;  %v1525_v12 = vpack.c.bf16 %v615_v11, %v614_v10 }
 0x2de   :  { %v691_v14 = vld [vmem:[#allocation5 + $0x388] sm:$0xff] }
 0x2df   :  { %v324_v16 = vmax.f32 %v321_v13, 0.0  ;;  %v690_v13 = vld [vmem:[#allocation5 + $0x380] sm:$0xff] }
 0x2e1   :  { %1182 = vmatmul.mubr.f32.vlgmr.msra.gmra.mrb[2].mxu1 %v324_v16  ;;  %1217 = vmatmul.mubr.f32.vlgmr.msra.gmra.mrb[4].mxu0 %v324_v16  ;;  %v1528_v16 = vpack.c.bf16 %v691_v14, %v690_v13  ;;  %v797_v13 = vld [vmem:[#allocation7 + $0x40] sm:$0xff] }
 0x2e2   :  { %1481 = vmatpush3.bf16.msra.mxu1 %v1480_v15  ;;  %1251 = vmatprep.mubr.msk.f32.mxu1 %vm1686_vm0, %v1687_v1  ;;  %v692_v15 = vld [vmem:[#allocation5 + $0x390] sm:$0xff] }
 0x2e3   :  { %1482 = vmatprep.subr.bf16.mxu1 %v1685_v0  ;;  %1286 = vmatprep.mubr.msk.f32.mxu0 %vm1686_vm0, %v1687_v1  ;;  %v1531_v18 = vpack.c.bf16 %v693_v17, %v692_v15 }
 0x2e4   :  { %1505 = vmatpush3.bf16.msra.mxu0 %v1504_v41  ;;  %v1549_v41 = vpack.c.bf16 %v705_v40, %v704_v39 }
 0x2e5   :  { %1506 = vmatprep.subr.bf16.mxu0 %v1685_v0 }
 0x2e6   :  { %1484 = vmatpush3.bf16.msra.mxu1 %v1483_v19  ;;  %v694_v19 = vld [vmem:[#allocation5 + $0x3a0] sm:$0xff] }
 0x2e7   :  { %1485 = vmatprep.subr.bf16.mxu1 %v1685_v0  ;;  %v1534_v21 = vpack.c.bf16 %v695_v20, %v694_v19 }
 0x2e8   :  { %1508 = vmatpush3.bf16.msra.mxu0 %v1507_v43  ;;  %v781_v43 = vld [vmem:[#allocation5 + $0x408] sm:$0xff] }
 0x2e9   :  { %1509 = vmatprep.subr.bf16.mxu0 %v1685_v0  ;;  %v1552_v45 = vpack.c.bf16 %v781_v43, %v780_v42 }
 0x2ea   :  { %1487 = vmatpush3.bf16.msra.mxu1 %v1486_v22  ;;  %v696_v22 = vld [vmem:[#allocation5 + $0x3b0] sm:$0xff] }
 0x2eb   :  { %1488 = vmatprep.subr.bf16.mxu1 %v1685_v0  ;;  %v1537_v24 = vpack.c.bf16 %v697_v23, %v696_v22 }
 0x2ec   :  { %1511 = vmatpush3.bf16.msra.mxu0 %v1510_v46  ;;  %v783_v46 = vld [vmem:[#allocation5 + $0x418] sm:$0xff] }
 0x2ed   :  { %1512 = vmatprep.subr.bf16.mxu0 %v1685_v0  ;;  %v1555_v47 = vpack.c.bf16 %v783_v46, %v782_v44 }
 0x2ee   :  { %1490 = vmatpush3.bf16.msra.mxu1 %v1489_v25  ;;  %v698_v25 = vld [vmem:[#allocation5 + $0x3c0] sm:$0xff] }
 0x2ef   :  { %1491 = vmatprep.subr.bf16.mxu1 %v1685_v0  ;;  %v1540_v27 = vpack.c.bf16 %v699_v26, %v698_v25 }
 0x2f0   :  { %1514 = vmatpush3.bf16.msra.mxu0 %v1513_v49  ;;  %v785_v49 = vld [vmem:[#allocation5 + $0x428] sm:$0xff] }
 0x2f1   :  { %1515 = vmatprep.subr.bf16.mxu0 %v1685_v0  ;;  %v1558_v50 = vpack.c.bf16 %v785_v49, %v784_v48 }
 0x2f2   :  { %1493 = vmatpush3.bf16.msra.mxu1 %v1492_v28  ;;  %v700_v28 = vld [vmem:[#allocation5 + $0x3d0] sm:$0xff] }
 0x2f3   :  { %1494 = vmatprep.subr.bf16.mxu1 %v1685_v0  ;;  %v1543_v30 = vpack.c.bf16 %v701_v29, %v700_v28 }
 0x2f4   :  { %1517 = vmatpush3.bf16.msra.mxu0 %v1516_v52 }
 0x2f5   :  { %1518 = vmatprep.subr.bf16.mxu0 %v1685_v0 }
 0x2f6   :  { %1496 = vmatpush3.bf16.msra.mxu1 %v1495_v31  ;;  %v702_v31 = vld [vmem:[#allocation5 + $0x3e0] sm:$0xff] }
 0x2f7   :  { %1497 = vmatprep.subr.bf16.mxu1 %v1685_v0  ;;  %v1546_v33 = vpack.c.bf16 %v703_v32, %v702_v31 }
 0x2f8   :  { %1520 = vmatpush3.bf16.msra.mxu0 %v1519_v55  ;;  %v1564_v55 = vpack.c.bf16 %v789_v54, %v788_v53 }
 0x2f9   :  { %1521 = vmatprep.subr.bf16.mxu0 %v1685_v0 }
 0x2fa   :  { %1499 = vmatpush3.bf16.msra.mxu1 %v1498_v34  ;;  %v527_v34 = vld [vmem:[#allocation7 + $0x28] sm:$0xff] }
 0x2fb   :  { %1500 = vmatprep.subr.bf16.mxu1 %v1685_v0 }
 0x2fc   :  { %1523 = vmatpush3.bf16.msra.mxu0 %v1522_v58  ;;  %v1567_v58 = vpack.c.bf16 %v791_v57, %v790_v56 }
 0x2fd   :  { %1524 = vmatprep.subr.bf16.mxu0 %v1685_v0 }
 0x2fe   :  { %1502 = vmatpush3.bf16.msra.mxu1 %v1501_v37 }
 0x2ff   :  { %1527 = vmatprep.subr.bf16.mxu1 %v1685_v0 }
 0x300   :  { %1526 = vmatpush3.bf16.msra.mxu0 %v1525_v12 }
 0x301   :  { %1551 = vmatprep.subr.bf16.mxu0 %v1685_v0 }
 0x3b4   :  { %v410_v61 = vpop.f32.mrb[2].mxu1  ;;  %v499_v62 = vpop.f32.mrb[4].mxu0 }
 0x3b5   :  { %v411_v63 = vadd.f32 %v410_v61, %v343_v59  ;;  %v500_v2 = vadd.f32 %v499_v62, %v432_v60  ;;  %v1183_v3 = vpop.f32.mrb[3].mxu1  ;;  %v1218_v4 = vpop.f32.mrb[5].mxu0  ;;  %v792_v59 = vld [vmem:[#allocation5 + $0x460] sm:$0xff]  ;;  %v793_v60 = vld [vmem:[#allocation5 + $0x468] sm:$0xff]  ;;  %v617_v62 = vld [vmem:[#allocation7 + $0x30] sm:$0xff] }
 0x3b6   :  { %v1570_v61 = vpack.c.bf16 %v793_v60, %v792_v59 }
 0x3b7   :  { %870 = vst [vmem:[#allocation8 + $0x8] sm:$0xff] %v411_v63  ;;  %v505_v5 = vmul.f32 1.442695, %v500_v2  ;;  %872 = vst [vmem:[#allocation8 + $0x10] sm:$0xff] %v500_v2 }
 0x3b9   :  { %1584 = vpow2.f32 %v505_v5  ;;  %v794_v5 = vld [vmem:[#allocation5 + $0x470] sm:$0xff] }
 0x3c3   :  { %v1585_v7 = vpop.eup %1584 }
 0x3c4   :  { %v507_v8 = vmul.f32 %v1585_v7, %v504_v6  ;;  %v795_v6 = vld [vmem:[#allocation5 + $0x478] sm:$0xff] }
 0x3c5   :  { %v1573_v7 = vpack.c.bf16 %v795_v6, %v794_v5 }
 0x3c6   :  { %v508_v9 = vadd.f32 %v507_v8, %v411_v63  ;;  %v707_v8 = vld [vmem:[#allocation7 + $0x38] sm:$0xff] }
 0x3c8   :  { %1252 = vmatmul.mubr.f32.vlgmr.msra.gmra.mrb[4].mxu1 %v508_v9 }
 0x3c9   :  { %1321 = vmatprep.mubr.msk.f32.mxu1 %vm1686_vm0, %v1687_v1  ;;  %1529 = vmatpush3.bf16.msra.mxu1 %v1528_v16 }
 0x3ca   :  { %1530 = vmatprep.subr.bf16.mxu1 %v1685_v0 }
 0x3cd   :  { %1532 = vmatpush3.bf16.msra.mxu1 %v1531_v18 }
 0x3ce   :  { %1533 = vmatprep.subr.bf16.mxu1 %v1685_v0 }
 0x3d1   :  { %1535 = vmatpush3.bf16.msra.mxu1 %v1534_v21 }
 0x3d2   :  { %1536 = vmatprep.subr.bf16.mxu1 %v1685_v0 }
 0x3d5   :  { %1538 = vmatpush3.bf16.msra.mxu1 %v1537_v24 }
 0x3d6   :  { %1539 = vmatprep.subr.bf16.mxu1 %v1685_v0 }
 0x3d9   :  { %1541 = vmatpush3.bf16.msra.mxu1 %v1540_v27 }
 0x3da   :  { %1542 = vmatprep.subr.bf16.mxu1 %v1685_v0 }
 0x3dd   :  { %1544 = vmatpush3.bf16.msra.mxu1 %v1543_v30 }
 0x3de   :  { %1545 = vmatprep.subr.bf16.mxu1 %v1685_v0 }
 0x3e1   :  { %1547 = vmatpush3.bf16.msra.mxu1 %v1546_v33 }
 0x3e2   :  { %1548 = vmatprep.subr.bf16.mxu1 %v1685_v0 }
 0x3e5   :  { %1550 = vmatpush3.bf16.msra.mxu1 %v1549_v41 }
 0x49b   :  { %v594_v35 = vpop.f32.mrb[4].mxu1 }
 0x49c   :  { %v595_v36 = vadd.f32 %v594_v35, %v527_v34  ;;  %v1253_v37 = vpop.f32.mrb[5].mxu1 }
 0x49e   :  { %v598_v38 = vmax.f32 %v595_v36, 0.0 }
 0x4a0   :  { %1287 = vmatmul.mubr.f32.vlgmr.msra.gmra.mrb[6].mxu0 %v598_v38 }
 0x4a1   :  { %1356 = vmatprep.mubr.msk.f32.mxu0 %vm1686_vm0, %v1687_v1  ;;  %1553 = vmatpush3.bf16.msra.mxu0 %v1552_v45  ;;  %v786_v1 = vld [vmem:[#allocation5 + $0x430] sm:$0xff] }
 0x4a2   :  { %1554 = vmatprep.subr.bf16.mxu0 %v1685_v0  ;;  %v1561_v52 = vpack.c.bf16 %v787_v51, %v786_v1 }
 0x4a5   :  { %1556 = vmatpush3.bf16.msra.mxu0 %v1555_v47 }
 0x4a6   :  { %1557 = vmatprep.subr.bf16.mxu0 %v1685_v0 }
 0x4a9   :  { %1559 = vmatpush3.bf16.msra.mxu0 %v1558_v50 }
 0x4aa   :  { %1560 = vmatprep.subr.bf16.mxu0 %v1685_v0 }
 0x4ad   :  { %1562 = vmatpush3.bf16.msra.mxu0 %v1561_v52 }
 0x4ae   :  { %1563 = vmatprep.subr.bf16.mxu0 %v1685_v0 }
 0x4b1   :  { %1565 = vmatpush3.bf16.msra.mxu0 %v1564_v55 }
 0x4b2   :  { %1566 = vmatprep.subr.bf16.mxu0 %v1685_v0 }
 0x4b5   :  { %1568 = vmatpush3.bf16.msra.mxu0 %v1567_v58 }
 0x4b6   :  { %1569 = vmatprep.subr.bf16.mxu0 %v1685_v0 }
 0x4b9   :  { %1571 = vmatpush3.bf16.msra.mxu0 %v1570_v61 }
 0x4ba   :  { %1572 = vmatprep.subr.bf16.mxu0 %v1685_v0 }
 0x4bd   :  { %1574 = vmatpush3.bf16.msra.mxu0 %v1573_v7 }
 0x573   :  { %v684_v63 = vpop.f32.mrb[6].mxu0 }
 0x574   :  { %v685_v2 = vadd.f32 %v684_v63, %v617_v62  ;;  %v1288_v3 = vpop.f32.mrb[7].mxu0 }
 0x576   :  { %v688_v4 = vmax.f32 %v685_v2, 0.0 }
 0x578   :  { %1322 = vmatmul.mubr.f32.vlgmr.msra.gmra.mrb[6].mxu1 %v688_v4 }
 0x64b   :  { %v774_v9 = vpop.f32.mrb[6].mxu1 }
 0x64c   :  { %v775_v10 = vadd.f32 %v774_v9, %v707_v8  ;;  %v1323_v11 = vpop.f32.mrb[7].mxu1 }
 0x64e   :  { %v778_v12 = vmax.f32 %v775_v10, 0.0 }
 0x650   :  { %1357 = vmatmul.mubr.f32.vlgmr.msra.gmra.mrb[8].mxu0 %v778_v12 }
 0x723   :  { %v864_v0 = vpop.f32.mrb[8].mxu0 }
 0x724   :  { %v865_v14 = vadd.f32 %v864_v0, %v797_v13  ;;  %v1358_v15 = vpop.f32.mrb[9].mxu0 }
 0x726   :  { %868 = vst [vmem:[#allocation8] sm:$0xff] %v865_v14 }
 0x727   :  { %1663 = shalt.err (!%p1660_p0)
}
 0x728   :  { %s1664_s27 = scalar_lea.hbm %s1869_s3, 384 }
 0x729   :  { %p1665_p1 = scmp.ne.s32.totalorder %s1869_s3, %s1664_s27  ;;  %p1668_p2 = scmp.lt.u32.totalorder %s1664_s27, %s1869_s3 }
 0x72b   :  { %p1670_p3 = pnand %p1668_p2, %p1665_p1 }
 0x72d   :  { %1673 = shalt.err (!%p1670_p3)
}
 0x72e   :  { %884 = dma.vmem_to_hbm [thread:$0]  %s879_s21, 384, %s1869_s3, [#allocation4], %s1682_s24, %s1682_s24, %s1683_s25  }
 0x72f   :  { %1678 = dma.done.wait [#allocation4], 384  }
 0x730   :  { %1679 = vsyncadd [#allocation4], 4294966912 }
 0x731   :  { %888 = vsyncpa [#allocation3], 1 }
 0x732   :  { %889 = vsyncpa [#allocation6], 1 }
 0x733   :  { %890 = vsyncpa [#allocation4], 1 }

</bundles_post_ra>
